<compile_context>
chip_gen: v6e
topology: v6e:2x2x1
jax: 0.10.0
libtpu: 0.0.40
codegen_flags: <defaults>
</compile_context>

<pallas_src>
import jax
import jax.numpy as jnp
from jax.experimental import pallas as pl
from jax.experimental.pallas import tpu as pltpu


_NEG_SLOPE = 0.01  # matches nn.LeakyReLU(negative_slope=0.01)


def _leaky_relu(v):
    return jnp.where(v > 0, v, _NEG_SLOPE * v)


def _round_up(x, m):
    return (x + m - 1) // m * m


# ----------------------------- kernels ------------------------------------- #

def _bb_kernel_single(x_ref, w1_ref, b1_ref, w2_ref, b2_ref, o_ref):
    """Whole hidden dim resident: grid = (batch tiles,). Direct store, no scratch."""
    x = x_ref[...].astype(jnp.float32)                       # (tile_b, Dp)
    h = jnp.dot(x.astype(jnp.bfloat16), w1_ref[...],
                preferred_element_type=jnp.float32)
    h = _leaky_relu(h + b1_ref[...])
    y = jnp.dot(h.astype(jnp.bfloat16), w2_ref[...],
                preferred_element_type=jnp.float32)
    y = y + b2_ref[...] + x                                  # fc2 bias + residual
    o_ref[...] = _leaky_relu(y).astype(o_ref.dtype)


def _bb_kernel_ktiled(x_ref, w1_ref, b1_ref, w2_ref, b2_ref, o_ref, acc_ref):
    """grid = (batch tiles, hidden-dim K tiles).

        j == 0   : acc = x + b2                  (residual + fc2 bias folded in)
        every j  : acc += LeakyReLU(x @ w1[:, j] + b1[j]) @ w2[j, :]
        j == last: out = LeakyReLU(acc)
    """
    j = pl.program_id(1)
    x = x_ref[...]                                           # (tile_b, Dp)

    @pl.when(j == 0)
    def _init():
        acc_ref[...] = x.astype(jnp.float32) + b2_ref[...]

    h = jnp.dot(x.astype(jnp.bfloat16), w1_ref[...],
                preferred_element_type=jnp.float32)
    h = _leaky_relu(h + b1_ref[...])
    acc_ref[...] += jnp.dot(h.astype(jnp.bfloat16), w2_ref[...],
                            preferred_element_type=jnp.float32)

    @pl.when(j == pl.num_programs(1) - 1)
    def _finalize():
        o_ref[...] = _leaky_relu(acc_ref[...]).astype(o_ref.dtype)


# --------------------------- pallas_call builders --------------------------- #

def _call_single(Bp, Dp, tile_b, out_dtype, vmem_limit, single_buffer_weights):
    w_kwargs = {}
    if single_buffer_weights:
        # Constant index map -> second pipeline buffer is pure VMEM waste.
        w_kwargs = dict(pipeline_mode=pl.Buffered(1))
    return pl.pallas_call(
        _bb_kernel_single,
        out_shape=jax.ShapeDtypeStruct((Bp, Dp), out_dtype),
        grid_spec=pltpu.PrefetchScalarGridSpec(
            num_scalar_prefetch=0,
            grid=(Bp // tile_b,),
            in_specs=[
                pl.BlockSpec((tile_b, Dp), lambda i: (i, 0)),             # x
                pl.BlockSpec((Dp, Dp), lambda i: (0, 0), **w_kwargs),     # w1 bf16
                pl.BlockSpec((1, Dp), lambda i: (0, 0)),                  # b1 f32
                pl.BlockSpec((Dp, Dp), lambda i: (0, 0), **w_kwargs),     # w2 bf16
                pl.BlockSpec((1, Dp), lambda i: (0, 0)),                  # b2 f32
            ],
            out_specs=pl.BlockSpec((tile_b, Dp), lambda i: (i, 0)),
        ),
        compiler_params=pltpu.CompilerParams(
            dimension_semantics=("parallel",),
            vmem_limit_bytes=int(vmem_limit),
        ),
    )


def _call_ktiled(Bp, Dp, tile_b, tk, out_dtype, vmem_limit):
    return pl.pallas_call(
        _bb_kernel_ktiled,
        out_shape=jax.ShapeDtypeStruct((Bp, Dp), out_dtype),
        grid_spec=pltpu.PrefetchScalarGridSpec(
            num_scalar_prefetch=0,
            grid=(Bp // tile_b, Dp // tk),
            in_specs=[
                pl.BlockSpec((tile_b, Dp), lambda i, j: (i, 0)),          # x
                pl.BlockSpec((Dp, tk), lambda i, j: (0, j)),              # w1 bf16
                pl.BlockSpec((1, tk), lambda i, j: (0, j)),               # b1 f32
                pl.BlockSpec((tk, Dp), lambda i, j: (j, 0)),              # w2 bf16
                pl.BlockSpec((1, Dp), lambda i, j: (0, 0)),               # b2 f32
            ],
            out_specs=pl.BlockSpec((tile_b, Dp), lambda i, j: (i, 0)),
            scratch_shapes=[pltpu.VMEM((tile_b, Dp), jnp.float32)],
        ),
        compiler_params=pltpu.CompilerParams(
            dimension_semantics=("parallel", "arbitrary"),
            vmem_limit_bytes=int(vmem_limit),
        ),
    )


# ------------------------------- wrapper ------------------------------------ #

def basic_block(x, w1, b1, w2, b2, *, tile_b=None, tk=None):
    """out = LeakyReLU(LeakyReLU(x @ w1 + b1) @ w2 + b2 + x).

    x: (B, D).  w1, w2: (D, D) in (in, out) layout (transpose of nn.Linear.weight).
    b1, b2: (D,).  Residual requires input_dim == output_dim (as in the module).
    """
    B, D = x.shape
    assert w1.shape == (D, D) and w2.shape == (D, D)
    assert b1.shape == (D,) and b2.shape == (D,)
    out_dtype = x.dtype

    # ---- lane-dense padding (features -> mult of 128, batch -> mult of 8) ----
    Dp = _round_up(max(D, 128), 128)
    Bp = _round_up(max(B, 8), 8)
    pad_d, pad_b = Dp - D, Bp - B

    xp = jnp.pad(x, ((0, pad_b), (0, pad_d))) if (pad_b or pad_d) else x
    w1p = jnp.pad(w1, ((0, pad_d), (0, pad_d))) if pad_d else w1
    w2p = jnp.pad(w2, ((0, pad_d), (0, pad_d))) if pad_d else w2
    b1p = jnp.pad(b1, (0, pad_d)) if pad_d else b1
    b2p = jnp.pad(b2, (0, pad_d)) if pad_d else b2

    # bf16 weights for MXU throughput; biases / accumulator stay f32.
    w1p = w1p.astype(jnp.bfloat16)
    w2p = w2p.astype(jnp.bfloat16)
    b1p = b1p.reshape(1, Dp).astype(jnp.float32)
    b2p = b2p.reshape(1, Dp).astype(jnp.float32)

    x_bytes = jnp.dtype(xp.dtype).itemsize
    o_bytes = jnp.dtype(out_dtype).itemsize

    # ---- K-tile (hidden dim) selection ----------------------------------------
    if tk is None:
        # Largest 128-multiple (<= 512) dividing Dp that keeps the streamed
        # (double-buffered) bf16 weight blocks under ~24 MiB (v7x-safe).
        tk = 512
        while tk > 128 and (Dp % tk != 0 or 2 * 2 * Dp * tk * 2 > 24 * 2**20):
            tk -= 128
        if Dp % tk != 0:
            tk = 128
    assert tk % 128 == 0 and Dp % tk == 0
    nk = Dp // tk
    single_path = (nk == 1)

    # ---- batch-tile selection ---------------------------------------------------
    if tile_b is None:
        # ~20 MiB budget for x (x2 buffers), out (x2 buffers) and the f32 acc;
        # prefer >= 2 batch grid steps so megacore gets both TensorCores busy.
        per_row = Dp * (2 * x_bytes + 2 * o_bytes + 4)
        cap = max(8, (20 * 2**20) // per_row // 8 * 8)
        tile_b = max(8, min(Bp, 256, cap))
        while Bp % tile_b:
            tile_b -= 8
        if Bp // tile_b < 2 and Bp >= 16 and (Bp // 2) % 8 == 0:
            tile_b = Bp // 2
    assert tile_b % 8 == 0 and Bp % tile_b == 0

    # ---- VMEM budget -------------------------------------------------------------
    w_bufs = 1 if single_path else 2
    vmem_est = (
        2 * tile_b * Dp * x_bytes                 # x tiles (double-buffered)
        + 2 * tile_b * Dp * o_bytes               # out tiles
        + (0 if single_path else tile_b * Dp * 4)  # f32 accumulator scratch
        + w_bufs * Dp * tk * 2                    # w1 block(s), bf16
        + w_bufs * tk * Dp * 2                    # w2 block(s), bf16
        + 2 * tk * 4 + 2 * Dp * 4                 # biases
    )
    vmem_limit = min(64 * 2**20, max(16 * 2**20, vmem_est * 3 // 2 + (2 << 20)))

    args = (xp, w1p, b1p, w2p, b2p)
    if single_path:
        try:
            out = _call_single(Bp, Dp, tile_b, out_dtype, vmem_limit, True)(*args)
        except Exception:
            # pl.Buffered(1) not supported here -> default pipelining.
            out = _call_single(Bp, Dp, tile_b, out_dtype, vmem_limit, False)(*args)
    else:
        out = _call_ktiled(Bp, Dp, tile_b, tk, out_dtype, vmem_limit)(*args)

    if pad_b or pad_d:
        out = out[:B, :D]
    return out


def basic_block_ref(x, w1, b1, w2, b2, *, bf16_matmul=False):
    """Pure-JAX reference matching the PyTorch forward."""
    def mm(a, b):
        if bf16_matmul:
            return jnp.dot(a.astype(jnp.bfloat16), b.astype(jnp.bfloat16),
                           preferred_element_type=jnp.float32)
        return jnp.dot(a, b, preferred_element_type=jnp.float32)
    h = _leaky_relu(mm(x, w1) + b1)
    y = mm(h, w2) + b2 + x
    return _leaky_relu(y).astype(x.dtype)


if __name__ == "__main__":
    key = jax.random.PRNGKey(0)
    ks = jax.random.split(key, 10)

    # --- case 1: small unaligned shape -> padding path + single-K kernel -------
    B, D = 8, 32
    x = jax.random.normal(ks[0], (B, D), dtype=jnp.float32)
    w1 = jax.random.normal(ks[1], (D, D), dtype=jnp.float32) * 0.1   # (in, out)
    b1 = jax.random.normal(ks[2], (D,), dtype=jnp.float32) * 0.1
    w2 = jax.random.normal(ks[3], (D, D), dtype=jnp.float32) * 0.1
    b2 = jax.random.normal(ks[4], (D,), dtype=jnp.float32) * 0.1

    out = jax.block_until_ready(basic_block(x, w1, b1, w2, b2))
    assert out.shape == (B, D)
    # Tight check vs. a reference using the same bf16 MXU operands,
    # loose check vs. the pure-f32 PyTorch-equivalent reference.
    assert jnp.allclose(out, basic_block_ref(x, w1, b1, w2, b2, bf16_matmul=True),
                        atol=2e-3, rtol=2e-3)
    assert jnp.allclose(out, basic_block_ref(x, w1, b1, w2, b2, bf16_matmul=False),
                        atol=5e-2, rtol=5e-2)

    # --- case 2: aligned shape, forced K-tiling (nk=2) -> accumulator path -----
    B2, D2 = 16, 256
    x2 = jax.random.normal(ks[5], (B2, D2), dtype=jnp.float32)
    w3 = jax.random.normal(ks[6], (D2, D2), dtype=jnp.float32) * 0.05
    b3 = jax.random.normal(ks[7], (D2,), dtype=jnp.float32) * 0.05
    w4 = jax.random.normal(ks[8], (D2, D2), dtype=jnp.float32) * 0.05
    b4 = jax.random.normal(ks[9], (D2,), dtype=jnp.float32) * 0.05

    out2 = jax.block_until_ready(basic_block(x2, w3, b3, w4, b4, tile_b=8, tk=128))
    assert out2.shape == (B2, D2)
    assert jnp.allclose(out2, basic_block_ref(x2, w3, b3, w4, b4, bf16_matmul=True),
                        atol=2e-3, rtol=2e-3)

    print("KERNEL_OK")
</pallas_src>

<mosaic_0001>
module attributes {stable_mosaic.version = 11 : i64} {
  func.func @_bb_kernel_single(%arg0: i32, %arg1: memref<8x128xf32, #tpu.memory_space<vmem>>, %arg2: memref<128x128xbf16, #tpu.memory_space<vmem>>, %arg3: memref<1x128xf32, #tpu.memory_space<vmem>>, %arg4: memref<128x128xbf16, #tpu.memory_space<vmem>>, %arg5: memref<1x128xf32, #tpu.memory_space<vmem>>, %arg6: memref<8x128xf32, #tpu.memory_space<vmem>>) attributes {dimension_semantics = [#tpu.dimension_semantics<parallel>], iteration_bounds = array<i64: 1>, scalar_prefetch = 0 : i64, scratch_operands = 0 : i64, tpu.core_type = #tpu.core_type<tc>, window_params = [{transform_indices = @transform_0, window_bounds = array<i64: 8, 128>}, {pipeline_mode = #tpu.pipeline_mode<synchronous>, transform_indices = @transform_1, window_bounds = array<i64: 128, 128>}, {pipeline_mode = #tpu.pipeline_mode<synchronous>, transform_indices = @transform_2, window_bounds = array<i64: 1, 128>}, {pipeline_mode = #tpu.pipeline_mode<synchronous>, transform_indices = @transform_3, window_bounds = array<i64: 128, 128>}, {pipeline_mode = #tpu.pipeline_mode<synchronous>, transform_indices = @transform_4, window_bounds = array<i64: 1, 128>}, {transform_indices = @transform_5, window_bounds = array<i64: 8, 128>}]} {
    %c0 = arith.constant 0 : index
    %c0_0 = arith.constant 0 : index
    %0 = vector.load %arg1[%c0, %c0_0] : memref<8x128xf32, #tpu.memory_space<vmem>>, vector<8x128xf32>
    %1 = arith.truncf %0 : vector<8x128xf32> to vector<8x128xbf16>
    %c0_1 = arith.constant 0 : index
    %c0_2 = arith.constant 0 : index
    %2 = vector.load %arg2[%c0_1, %c0_2] : memref<128x128xbf16, #tpu.memory_space<vmem>>, vector<128x128xbf16>
    %cst = arith.constant dense<0.000000e+00> : vector<8x128xf32>
    %3 = tpu.matmul %1, %2, %cst {dimension_numbers = #tpu.dot_dimension_numbers<[1], [0], [0], [1], [0, 0, 1, 1], [], []>} : vector<8x128xbf16>, vector<128x128xbf16>, vector<8x128xf32> -> vector<8x128xf32>
    %c0_3 = arith.constant 0 : index
    %c0_4 = arith.constant 0 : index
    %4 = vector.load %arg3[%c0_3, %c0_4] : memref<1x128xf32, #tpu.memory_space<vmem>>, vector<1x128xf32>
    %5 = vector.broadcast %4 : vector<1x128xf32> to vector<8x128xf32>
    %6 = arith.addf %3, %5 : vector<8x128xf32>
    %cst_5 = arith.constant 0.000000e+00 : f32
    %7 = vector.broadcast %cst_5 : f32 to vector<8x128xf32>
    %8 = arith.cmpf ogt, %6, %7 : vector<8x128xf32>
    %cst_6 = arith.constant 0.00999999977 : f32
    %9 = vector.broadcast %cst_6 : f32 to vector<8x128xf32>
    %10 = arith.mulf %9, %6 : vector<8x128xf32>
    %11 = arith.select %8, %6, %10 : vector<8x128xi1>, vector<8x128xf32>
    %12 = arith.truncf %11 : vector<8x128xf32> to vector<8x128xbf16>
    %c0_7 = arith.constant 0 : index
    %c0_8 = arith.constant 0 : index
    %13 = vector.load %arg4[%c0_7, %c0_8] : memref<128x128xbf16, #tpu.memory_space<vmem>>, vector<128x128xbf16>
    %cst_9 = arith.constant dense<0.000000e+00> : vector<8x128xf32>
    %14 = tpu.matmul %12, %13, %cst_9 {dimension_numbers = #tpu.dot_dimension_numbers<[1], [0], [0], [1], [0, 0, 1, 1], [], []>} : vector<8x128xbf16>, vector<128x128xbf16>, vector<8x128xf32> -> vector<8x128xf32>
    %c0_10 = arith.constant 0 : index
    %c0_11 = arith.constant 0 : index
    %15 = vector.load %arg5[%c0_10, %c0_11] : memref<1x128xf32, #tpu.memory_space<vmem>>, vector<1x128xf32>
    %16 = vector.broadcast %15 : vector<1x128xf32> to vector<8x128xf32>
    %17 = arith.addf %14, %16 : vector<8x128xf32>
    %18 = arith.addf %17, %0 : vector<8x128xf32>
    %cst_12 = arith.constant 0.000000e+00 : f32
    %19 = vector.broadcast %cst_12 : f32 to vector<8x128xf32>
    %20 = arith.cmpf ogt, %18, %19 : vector<8x128xf32>
    %cst_13 = arith.constant 0.00999999977 : f32
    %21 = vector.broadcast %cst_13 : f32 to vector<8x128xf32>
    %22 = arith.mulf %21, %18 : vector<8x128xf32>
    %23 = arith.select %20, %18, %22 : vector<8x128xi1>, vector<8x128xf32>
    %c0_14 = arith.constant 0 : index
    %c0_15 = arith.constant 0 : index
    %24 = vector.load %arg6[%c0_14, %c0_15] : memref<8x128xf32, #tpu.memory_space<vmem>>, vector<8x128xf32>
    tpu.vector_store %arg6[%c0_14, %c0_15], %23 {strides = array<i32>} : memref<8x128xf32, #tpu.memory_space<vmem>>, vector<8x128xf32>,
    return
  }
  func.func @transform_0(%arg0: i32) -> (i32, i32) {
    %c0_i32 = arith.constant 0 : i32
    %c0_i32_0 = arith.constant 0 : i32
    return %arg0, %c0_i32 : i32, i32
  }
  func.func @transform_1(%arg0: i32) -> (i32, i32) {
    %c0_i32 = arith.constant 0 : i32
    %c0_i32_0 = arith.constant 0 : i32
    %c0_i32_1 = arith.constant 0 : i32
    return %c0_i32, %c0_i32_0 : i32, i32
  }
  func.func @transform_2(%arg0: i32) -> (i32, i32) {
    %c0_i32 = arith.constant 0 : i32
    %c0_i32_0 = arith.constant 0 : i32
    %c0_i32_1 = arith.constant 0 : i32
    return %c0_i32, %c0_i32_0 : i32, i32
  }
  func.func @transform_3(%arg0: i32) -> (i32, i32) {
    %c0_i32 = arith.constant 0 : i32
    %c0_i32_0 = arith.constant 0 : i32
    %c0_i32_1 = arith.constant 0 : i32
    return %c0_i32, %c0_i32_0 : i32, i32
  }
  func.func @transform_4(%arg0: i32) -> (i32, i32) {
    %c0_i32 = arith.constant 0 : i32
    %c0_i32_0 = arith.constant 0 : i32
    %c0_i32_1 = arith.constant 0 : i32
    return %c0_i32, %c0_i32_0 : i32, i32
  }
  func.func @transform_5(%arg0: i32) -> (i32, i32) {
    %c0_i32 = arith.constant 0 : i32
    %c0_i32_0 = arith.constant 0 : i32
    return %arg0, %c0_i32 : i32, i32
  }
}

module attributes {stable_mosaic.version = 11 : i64} {
  func.func @_bb_kernel_single(%arg0: i32, %arg1: memref<8x128xf32, #tpu.memory_space<vmem>>, %arg2: memref<128x128xbf16, #tpu.memory_space<vmem>>, %arg3: memref<1x128xf32, #tpu.memory_space<vmem>>, %arg4: memref<128x128xbf16, #tpu.memory_space<vmem>>, %arg5: memref<1x128xf32, #tpu.memory_space<vmem>>, %arg6: memref<8x128xf32, #tpu.memory_space<vmem>>) attributes {dimension_semantics = [#tpu.dimension_semantics<parallel>], iteration_bounds = array<i64: 1>, scalar_prefetch = 0 : i64, scratch_operands = 0 : i64, tpu.core_type = #tpu.core_type<tc>, window_params = [{transform_indices = @transform_0, window_bounds = array<i64: 8, 128>}, {pipeline_mode = #tpu.pipeline_mode<synchronous>, transform_indices = @transform_1, window_bounds = array<i64: 128, 128>}, {pipeline_mode = #tpu.pipeline_mode<synchronous>, transform_indices = @transform_2, window_bounds = array<i64: 1, 128>}, {pipeline_mode = #tpu.pipeline_mode<synchronous>, transform_indices = @transform_3, window_bounds = array<i64: 128, 128>}, {pipeline_mode = #tpu.pipeline_mode<synchronous>, transform_indices = @transform_4, window_bounds = array<i64: 1, 128>}, {transform_indices = @transform_5, window_bounds = array<i64: 8, 128>}]} {
    %c0 = arith.constant 0 : index
    %c0_0 = arith.constant 0 : index
    %0 = vector.load %arg1[%c0, %c0_0] : memref<8x128xf32, #tpu.memory_space<vmem>>, vector<8x128xf32>
    %1 = arith.truncf %0 : vector<8x128xf32> to vector<8x128xbf16>
    %c0_1 = arith.constant 0 : index
    %c0_2 = arith.constant 0 : index
    %2 = vector.load %arg2[%c0_1, %c0_2] : memref<128x128xbf16, #tpu.memory_space<vmem>>, vector<128x128xbf16>
    %cst = arith.constant dense<0.000000e+00> : vector<8x128xf32>
    %3 = tpu.matmul %1, %2, %cst {dimension_numbers = #tpu.dot_dimension_numbers<[1], [0], [0], [1], [0, 0, 1, 1], [], []>} : vector<8x128xbf16>, vector<128x128xbf16>, vector<8x128xf32> -> vector<8x128xf32>
    %c0_3 = arith.constant 0 : index
    %c0_4 = arith.constant 0 : index
    %4 = vector.load %arg3[%c0_3, %c0_4] : memref<1x128xf32, #tpu.memory_space<vmem>>, vector<1x128xf32>
    %5 = vector.broadcast %4 : vector<1x128xf32> to vector<8x128xf32>
    %6 = arith.addf %3, %5 : vector<8x128xf32>
    %cst_5 = arith.constant 0.000000e+00 : f32
    %7 = vector.broadcast %cst_5 : f32 to vector<8x128xf32>
    %8 = arith.cmpf ogt, %6, %7 : vector<8x128xf32>
    %cst_6 = arith.constant 0.00999999977 : f32
    %9 = vector.broadcast %cst_6 : f32 to vector<8x128xf32>
    %10 = arith.mulf %9, %6 : vector<8x128xf32>
    %11 = arith.select %8, %6, %10 : vector<8x128xi1>, vector<8x128xf32>
    %12 = arith.truncf %11 : vector<8x128xf32> to vector<8x128xbf16>
    %c0_7 = arith.constant 0 : index
    %c0_8 = arith.constant 0 : index
    %13 = vector.load %arg4[%c0_7, %c0_8] : memref<128x128xbf16, #tpu.memory_space<vmem>>, vector<128x128xbf16>
    %cst_9 = arith.constant dense<0.000000e+00> : vector<8x128xf32>
    %14 = tpu.matmul %12, %13, %cst_9 {dimension_numbers = #tpu.dot_dimension_numbers<[1], [0], [0], [1], [0, 0, 1, 1], [], []>} : vector<8x128xbf16>, vector<128x128xbf16>, vector<8x128xf32> -> vector<8x128xf32>
    %c0_10 = arith.constant 0 : index
    %c0_11 = arith.constant 0 : index
    %15 = vector.load %arg5[%c0_10, %c0_11] : memref<1x128xf32, #tpu.memory_space<vmem>>, vector<1x128xf32>
    %16 = vector.broadcast %15 : vector<1x128xf32> to vector<8x128xf32>
    %17 = arith.addf %14, %16 : vector<8x128xf32>
    %18 = arith.addf %17, %0 : vector<8x128xf32>
    %cst_12 = arith.constant 0.000000e+00 : f32
    %19 = vector.broadcast %cst_12 : f32 to vector<8x128xf32>
    %20 = arith.cmpf ogt, %18, %19 : vector<8x128xf32>
    %cst_13 = arith.constant 0.00999999977 : f32
    %21 = vector.broadcast %cst_13 : f32 to vector<8x128xf32>
    %22 = arith.mulf %21, %18 : vector<8x128xf32>
    %23 = arith.select %20, %18, %22 : vector<8x128xi1>, vector<8x128xf32>
    %c0_14 = arith.constant 0 : index
    %c0_15 = arith.constant 0 : index
    %24 = vector.load %arg6[%c0_14, %c0_15] : memref<8x128xf32, #tpu.memory_space<vmem>>, vector<8x128xf32>
    tpu.vector_store %arg6[%c0_14, %c0_15], %23 {strides = array<i32>} : memref<8x128xf32, #tpu.memory_space<vmem>>, vector<8x128xf32>,
    return
  }
  func.func @transform_0(%arg0: i32) -> (i32, i32) {
    %c0_i32 = arith.constant 0 : i32
    %c0_i32_0 = arith.constant 0 : i32
    return %arg0, %c0_i32 : i32, i32
  }
  func.func @transform_1(%arg0: i32) -> (i32, i32) {
    %c0_i32 = arith.constant 0 : i32
    %c0_i32_0 = arith.constant 0 : i32
    %c0_i32_1 = arith.constant 0 : i32
    return %c0_i32, %c0_i32_0 : i32, i32
  }
  func.func @transform_2(%arg0: i32) -> (i32, i32) {
    %c0_i32 = arith.constant 0 : i32
    %c0_i32_0 = arith.constant 0 : i32
    %c0_i32_1 = arith.constant 0 : i32
    return %c0_i32, %c0_i32_0 : i32, i32
  }
  func.func @transform_3(%arg0: i32) -> (i32, i32) {
    %c0_i32 = arith.constant 0 : i32
    %c0_i32_0 = arith.constant 0 : i32
    %c0_i32_1 = arith.constant 0 : i32
    return %c0_i32, %c0_i32_0 : i32, i32
  }
  func.func @transform_4(%arg0: i32) -> (i32, i32) {
    %c0_i32 = arith.constant 0 : i32
    %c0_i32_0 = arith.constant 0 : i32
    %c0_i32_1 = arith.constant 0 : i32
    return %c0_i32, %c0_i32_0 : i32, i32
  }
  func.func @transform_5(%arg0: i32) -> (i32, i32) {
    %c0_i32 = arith.constant 0 : i32
    %c0_i32_0 = arith.constant 0 : i32
    return %arg0, %c0_i32 : i32, i32
  }
}

</mosaic_0001>

<bundles_post_ra>
// kernel: tpu_custom_call.1
= control target key start
LH: loop header
LB: loop body
LE: loop exit
PB: predicated region body
PF: predicated region fallthrough
CT: control target
= control target key end

     0   :  { %10 = vsyncpa [#allocation3], 0  ;;  %s552_s0 = inlined_call_operand.hbm [shape: f32[8,128], index: 0, kind: input, shape index: {}]   ;;  %s553_s1 = inlined_call_operand.hbm [shape: bf16[128,128], index: 1, kind: input, shape index: {}]   ;;  %s554_s2 = inlined_call_operand.vmem [shape: f32[1,128], index: 2, kind: input, shape index: {}]   ;;  %s555_s3 = inlined_call_operand.hbm [shape: bf16[128,128], index: 3, kind: input, shape index: {}]   ;;  %s556_s4 = inlined_call_operand.vmem [shape: f32[1,128], index: 4, kind: input, shape index: {}]   ;;  %s557_s5 = inlined_call_operand.hbm [shape: f32[8,128], index: 5, kind: output, shape index: {}]  }
   0x1   :  { %11 = vsyncpa [#allocation6], 0 }
   0x2   :  { %12 = vsyncpa [#allocation4], 0  ;;  %s496_s18 = smov [#allocation5]  }
   0x3   :  { %s28_s19 = sshll.u32 %s496_s18, 4  ;;  %s29_s19 = int_to_ptr.vmem [resolvable:$true] %s28_s19 }
   0x4   :  { %s418_s20 = scalar_lea.vmem %s29_s19, 1024  ;;  %p423_p1 = scmp.lt.s32.totalorder %s29_s19, %s29_s19 }
   0x5   :  { %p419_p0 = scmp.ne.s32.totalorder %s29_s19, %s418_s20  ;;  %p424_p2 = scmp.lt.s32.totalorder %s418_s20, %s418_s20 }
   0x7   :  { %p425_p3 = por %p424_p2, %p423_p1 }
   0x9   :  { %p426_p4 = pnand %p425_p3, %p419_p0 }
   0xb   :  { %429 = shalt.err (!%p426_p4)
}
   0xc   :  { %s497_s21 = smov 64   ;;  %s498_s22 = smov 4  }
   0xd   :  { %34 = dma.hbm_to_vmem [thread:$0]  %s553_s1, 1024, %s29_s19, [#allocation6], %s497_s21, %s497_s21, %s498_s22  }
   0xe   :  { %s499_s25 = smov [#allocation2]   ;;  %s500_s27 = smov [#allocation7]  }
   0xf   :  { %s19_s26 = sshll.u32 %s499_s25, 4  ;;  %s42_s28 = sshll.u32 %s500_s27, 4  ;;  %s20_s26 = int_to_ptr.vmem [resolvable:$true] %s19_s26  ;;  %s43_s28 = int_to_ptr.vmem [resolvable:$true] %s42_s28 }
  0x10   :  { %s438_s29 = scalar_lea.vmem %s20_s26, 128  ;;  %p443_p6 = scmp.lt.s32.totalorder %s20_s26, %s20_s26 }
  0x11   :  { %p439_p5 = scmp.ne.s32.totalorder %s20_s26, %s438_s29  ;;  %p444_p7 = scmp.lt.s32.totalorder %s438_s29, %s438_s29 }
  0x13   :  { %p445_p8 = por %p444_p7, %p443_p6 }
  0x15   :  { %p446_p9 = pnand %p445_p8, %p439_p5 }
  0x17   :  { %449 = shalt.err (!%p446_p9)
}
  0x18   :  { %22 = dma.hbm_to_vmem [thread:$0]  %s552_s0, 128, %s20_s26, [#allocation3]  }
  0x19   :  { %s458_s7 = scalar_lea.vmem %s43_s28, 1024  ;;  %p463_p11 = scmp.lt.s32.totalorder %s43_s28, %s43_s28 }
  0x1a   :  { %p459_p10 = scmp.ne.s32.totalorder %s43_s28, %s458_s7  ;;  %p464_p12 = scmp.lt.s32.totalorder %s458_s7, %s458_s7 }
  0x1c   :  { %p465_p13 = por %p464_p12, %p463_p11 }
  0x1e   :  { %p466_p0 = pnand %p465_p13, %p459_p10 }
  0x20   :  { %469 = shalt.err (!%p466_p0)
}
  0x21   :  { %48 = dma.hbm_to_vmem [thread:$0]  %s555_s3, 1024, %s43_s28, [#allocation6], %s497_s21, %s497_s21, %s498_s22  }
  0x22   :  { %490 = dma.done.wait [#allocation3], 128  }
  0x23   :  { %491 = vsyncadd [#allocation3], 4294967168 }
  0x24   :  { %492 = dma.done.wait [#allocation6], 2048  }
  0x25   :  { %493 = vsyncadd [#allocation6], 4294965248  ;;  %v501_v0 = vmov 0.0   ;;  %vm502_vm0 = vmmov 0   ;;  %v394_v1 = vld [vmem:[#allocation5 + $0x38] sm:$0xff]   ;;  %v395_v2 = vld [vmem:[#allocation5 + $0x30] sm:$0xff]  }
  0x26   :  { %346 = vmatprep.subr.bf16.mxu0 %v501_v0  ;;  %362 = vmatprep.mubr.msk.bf16.mxu0 %vm502_vm0, %v501_v0  ;;  %v396_v3 = vld [vmem:[#allocation5 + $0x28] sm:$0xff]   ;;  %v402_v4 = vld [vmem:[#allocation7 + $0x38] sm:$0xff]   ;;  %v397_v5 = vld [vmem:[#allocation5 + $0x20] sm:$0xff]   ;;  %s503_s11 = smov [#allocation8]  }
  0x27   :  { %366 = vmatprep.subr.bf16.mxu1 %v501_v0  ;;  %382 = vmatprep.mubr.msk.bf16.mxu1 %vm502_vm0, %v501_v0  ;;  %v403_v6 = vld [vmem:[#allocation7 + $0x30] sm:$0xff]   ;;  %v398_v7 = vld [vmem:[#allocation5 + $0x18] sm:$0xff]   ;;  %v404_v8 = vld [vmem:[#allocation7 + $0x28] sm:$0xff]  }
  0x28   :  { %347 = vmatpush3.bf16.msra.mxu0 %v394_v1  ;;  %367 = vmatpush3.bf16.msra.mxu1 %v402_v4  ;;  %v399_v9 = vld [vmem:[#allocation5 + $0x10] sm:$0xff]   ;;  %v405_v10 = vld [vmem:[#allocation7 + $0x20] sm:$0xff]   ;;  %v400_v11 = vld [vmem:[#allocation5 + $0x8] sm:$0xff]  }
  0x29   :  { %348 = vmatprep.subr.bf16.mxu0 %v501_v0  ;;  %368 = vmatprep.subr.bf16.mxu1 %v501_v0  ;;  %v406_v12 = vld [vmem:[#allocation7 + $0x18] sm:$0xff]   ;;  %v401_v13 = vld [vmem:[#allocation5] sm:$0xff]   ;;  %v407_v15 = vld [vmem:[#allocation7 + $0x10] sm:$0xff]  }
  0x2a   :  { %v61_v14 = vld [vmem:[#allocation2] sm:$0xff]  ;;  %v408_v17 = vld [vmem:[#allocation7 + $0x8] sm:$0xff]   ;;  %v409_v18 = vld [vmem:[#allocation7] sm:$0xff]  }
  0x2b   :  { %v62_v16 = vpack.c.bf16 %v61_v14, %v61_v14  ;;  %v310_v19 = vld [vmem:[%s554_s2] ss:$0 sm:$0xff]  ;;  %s300_s2 = sshll.u32 %s503_s11, 4  ;;  %s301_s2 = int_to_ptr.vmem [resolvable:$true] %s300_s2 }
  0x2c   :  { %349 = vmatpush3.bf16.msra.mxu0 %v395_v2  ;;  %369 = vmatpush3.bf16.msra.mxu1 %v403_v6  ;;  %v319_v28 = vld [vmem:[%s556_s4] ss:$0 sm:$0xff]  ;;  %s470_s12 = scalar_lea.vmem %s301_s2, 128  ;;  %p475_p2 = scmp.lt.s32.totalorder %s301_s2, %s301_s2 }
  0x2d   :  { %350 = vmatprep.subr.bf16.mxu0 %v501_v0  ;;  %370 = vmatprep.subr.bf16.mxu1 %v501_v0  ;;  %p471_p1 = scmp.ne.s32.totalorder %s301_s2, %s470_s12  ;;  %p476_p3 = scmp.lt.s32.totalorder %s470_s12, %s470_s12 }
  0x2f   :  { %p477_p4 = por %p476_p3, %p475_p2 }
  0x30   :  { %351 = vmatpush3.bf16.msra.mxu0 %v396_v3  ;;  %371 = vmatpush3.bf16.msra.mxu1 %v404_v8 }
  0x31   :  { %352 = vmatprep.subr.bf16.mxu0 %v501_v0  ;;  %372 = vmatprep.subr.bf16.mxu1 %v501_v0  ;;  %p478_p5 = pnand %p477_p4, %p471_p1 }
  0x34   :  { %353 = vmatpush3.bf16.msra.mxu0 %v397_v5  ;;  %373 = vmatpush3.bf16.msra.mxu1 %v405_v10 }
  0x35   :  { %354 = vmatprep.subr.bf16.mxu0 %v501_v0  ;;  %374 = vmatprep.subr.bf16.mxu1 %v501_v0 }
  0x38   :  { %355 = vmatpush3.bf16.msra.mxu0 %v398_v7  ;;  %375 = vmatpush3.bf16.msra.mxu1 %v406_v12 }
  0x39   :  { %356 = vmatprep.subr.bf16.mxu0 %v501_v0  ;;  %376 = vmatprep.subr.bf16.mxu1 %v501_v0 }
  0x3c   :  { %357 = vmatpush3.bf16.msra.mxu0 %v399_v9  ;;  %377 = vmatpush3.bf16.msra.mxu1 %v407_v15 }
  0x3d   :  { %358 = vmatprep.subr.bf16.mxu0 %v501_v0  ;;  %378 = vmatprep.subr.bf16.mxu1 %v501_v0 }
  0x40   :  { %359 = vmatpush3.bf16.msra.mxu0 %v400_v11  ;;  %379 = vmatpush3.bf16.msra.mxu1 %v408_v17 }
  0x41   :  { %360 = vmatprep.subr.bf16.mxu0 %v501_v0  ;;  %380 = vmatprep.subr.bf16.mxu1 %v501_v0 }
  0x44   :  { %361 = vmatpush3.bf16.msra.mxu0 %v401_v13  ;;  %381 = vmatpush3.bf16.msra.mxu1 %v409_v18 }
  0x47   :  { %363 = vmatmul.mubr.bf16.vlgmr.msra.gmra.mxu0 %v62_v16 }
 0x107   :  { %v168_v20 = vpop.f32.mrf.mxu0 }
 0x108   :  { %v169_v21 = vadd.f32 %v310_v19, %v168_v20 }
 0x109   :  { %v364_v22 = vpop.f32.mrf.mxu0 }
 0x10a   :  { %vm174_vm1 = vcmp.gt.f32.partialorder %v169_v21, 0.0  ;;  %v175_v23 = vmul.f32 0.01, %v169_v21 }
 0x10b   :  { %v171_v24 = vpop.f32.mrf.mxu0 }
 0x10c   :  { %v176_v25 = vsel %vm174_vm1, %v169_v21, %v175_v23 }
 0x10d   :  { %v365_v26 = vpop.f32.mrf.mxu0  ;;  %v177_v27 = vpack.c.bf16 %v176_v25, %v176_v25 }
 0x10f   :  { %383 = vmatmul.mubr.bf16.vlgmr.msra.gmra.mxu1 %v177_v27 }
 0x1cf   :  { %v283_v29 = vpop.f32.mrf.mxu1 }
 0x1d0   :  { %v284_v30 = vadd.f32 %v319_v28, %v283_v29 }
 0x1d1   :  { %v384_v31 = vpop.f32.mrf.mxu1 }
 0x1d2   :  { %v289_v32 = vadd.f32 %v284_v30, %v61_v14 }
 0x1d3   :  { %v286_v33 = vpop.f32.mrf.mxu1 }
 0x1d4   :  { %v291_v34 = vmul.f32 0.01, %v289_v32  ;;  %vm290_vm2 = vcmp.gt.f32.partialorder %v289_v32, 0.0 }
 0x1d5   :  { %v385_v35 = vpop.f32.mrf.mxu1 }
 0x1d6   :  { %v292_v36 = vsel %vm290_vm2, %v289_v32, %v291_v34 }
 0x1d7   :  { %293 = vst [vmem:[#allocation8] sm:$0xff] %v292_v36 }
 0x1d8   :  { %481 = shalt.err (!%p478_p5)
}
 0x1d9   :  { %303 = dma.vmem_to_hbm [thread:$0]  %s301_s2, 128, %s557_s5, [#allocation4]  }
 0x1da   :  { %494 = dma.done.wait [#allocation4], 128  }
 0x1db   :  { %495 = vsyncadd [#allocation4], 4294967168 }
 0x1dc   :  { %307 = vsyncpa [#allocation3], 1 }
 0x1dd   :  { %308 = vsyncpa [#allocation6], 1 }
 0x1de   :  { %309 = vsyncpa [#allocation4], 1 }

// kernel: tpu_custom_call.1
= control target key start
LH: loop header
LB: loop body
LE: loop exit
PB: predicated region body
PF: predicated region fallthrough
CT: control target
= control target key end

     0   :  { %10 = vsyncpa [#allocation3], 0  ;;  %s552_s0 = inlined_call_operand.hbm [shape: f32[8,128], index: 0, kind: input, shape index: {}]   ;;  %s553_s1 = inlined_call_operand.hbm [shape: bf16[128,128], index: 1, kind: input, shape index: {}]   ;;  %s554_s2 = inlined_call_operand.vmem [shape: f32[1,128], index: 2, kind: input, shape index: {}]   ;;  %s555_s3 = inlined_call_operand.hbm [shape: bf16[128,128], index: 3, kind: input, shape index: {}]   ;;  %s556_s4 = inlined_call_operand.vmem [shape: f32[1,128], index: 4, kind: input, shape index: {}]   ;;  %s557_s5 = inlined_call_operand.hbm [shape: f32[8,128], index: 5, kind: output, shape index: {}]  }
   0x1   :  { %11 = vsyncpa [#allocation6], 0 }
   0x2   :  { %12 = vsyncpa [#allocation4], 0  ;;  %s496_s18 = smov [#allocation5]  }
   0x3   :  { %s28_s19 = sshll.u32 %s496_s18, 4  ;;  %s29_s19 = int_to_ptr.vmem [resolvable:$true] %s28_s19 }
   0x4   :  { %s418_s20 = scalar_lea.vmem %s29_s19, 1024  ;;  %p423_p1 = scmp.lt.s32.totalorder %s29_s19, %s29_s19 }
   0x5   :  { %p419_p0 = scmp.ne.s32.totalorder %s29_s19, %s418_s20  ;;  %p424_p2 = scmp.lt.s32.totalorder %s418_s20, %s418_s20 }
   0x7   :  { %p425_p3 = por %p424_p2, %p423_p1 }
   0x9   :  { %p426_p4 = pnand %p425_p3, %p419_p0 }
   0xb   :  { %429 = shalt.err (!%p426_p4)
}
   0xc   :  { %s497_s21 = smov 64   ;;  %s498_s22 = smov 4  }
   0xd   :  { %34 = dma.hbm_to_vmem [thread:$0]  %s553_s1, 1024, %s29_s19, [#allocation6], %s497_s21, %s497_s21, %s498_s22  }
   0xe   :  { %s499_s25 = smov [#allocation2]   ;;  %s500_s27 = smov [#allocation7]  }
   0xf   :  { %s19_s26 = sshll.u32 %s499_s25, 4  ;;  %s42_s28 = sshll.u32 %s500_s27, 4  ;;  %s20_s26 = int_to_ptr.vmem [resolvable:$true] %s19_s26  ;;  %s43_s28 = int_to_ptr.vmem [resolvable:$true] %s42_s28 }
  0x10   :  { %s438_s29 = scalar_lea.vmem %s20_s26, 128  ;;  %p443_p6 = scmp.lt.s32.totalorder %s20_s26, %s20_s26 }
  0x11   :  { %p439_p5 = scmp.ne.s32.totalorder %s20_s26, %s438_s29  ;;  %p444_p7 = scmp.lt.s32.totalorder %s438_s29, %s438_s29 }
  0x13   :  { %p445_p8 = por %p444_p7, %p443_p6 }
  0x15   :  { %p446_p9 = pnand %p445_p8, %p439_p5 }
  0x17   :  { %449 = shalt.err (!%p446_p9)
}
  0x18   :  { %22 = dma.hbm_to_vmem [thread:$0]  %s552_s0, 128, %s20_s26, [#allocation3]  }
  0x19   :  { %s458_s7 = scalar_lea.vmem %s43_s28, 1024  ;;  %p463_p11 = scmp.lt.s32.totalorder %s43_s28, %s43_s28 }
  0x1a   :  { %p459_p10 = scmp.ne.s32.totalorder %s43_s28, %s458_s7  ;;  %p464_p12 = scmp.lt.s32.totalorder %s458_s7, %s458_s7 }
  0x1c   :  { %p465_p13 = por %p464_p12, %p463_p11 }
  0x1e   :  { %p466_p0 = pnand %p465_p13, %p459_p10 }
  0x20   :  { %469 = shalt.err (!%p466_p0)
}
  0x21   :  { %48 = dma.hbm_to_vmem [thread:$0]  %s555_s3, 1024, %s43_s28, [#allocation6], %s497_s21, %s497_s21, %s498_s22  }
  0x22   :  { %490 = dma.done.wait [#allocation3], 128  }
  0x23   :  { %491 = vsyncadd [#allocation3], 4294967168 }
  0x24   :  { %492 = dma.done.wait [#allocation6], 2048  }
  0x25   :  { %493 = vsyncadd [#allocation6], 4294965248  ;;  %v501_v0 = vmov 0.0   ;;  %vm502_vm0 = vmmov 0   ;;  %v394_v1 = vld [vmem:[#allocation5 + $0x38] sm:$0xff]   ;;  %v395_v2 = vld [vmem:[#allocation5 + $0x30] sm:$0xff]  }
  0x26   :  { %346 = vmatprep.subr.bf16.mxu0 %v501_v0  ;;  %362 = vmatprep.mubr.msk.bf16.mxu0 %vm502_vm0, %v501_v0  ;;  %v396_v3 = vld [vmem:[#allocation5 + $0x28] sm:$0xff]   ;;  %v402_v4 = vld [vmem:[#allocation7 + $0x38] sm:$0xff]   ;;  %v397_v5 = vld [vmem:[#allocation5 + $0x20] sm:$0xff]   ;;  %s503_s11 = smov [#allocation8]  }
  0x27   :  { %366 = vmatprep.subr.bf16.mxu1 %v501_v0  ;;  %382 = vmatprep.mubr.msk.bf16.mxu1 %vm502_vm0, %v501_v0  ;;  %v403_v6 = vld [vmem:[#allocation7 + $0x30] sm:$0xff]   ;;  %v398_v7 = vld [vmem:[#allocation5 + $0x18] sm:$0xff]   ;;  %v404_v8 = vld [vmem:[#allocation7 + $0x28] sm:$0xff]  }
  0x28   :  { %347 = vmatpush3.bf16.msra.mxu0 %v394_v1  ;;  %367 = vmatpush3.bf16.msra.mxu1 %v402_v4  ;;  %v399_v9 = vld [vmem:[#allocation5 + $0x10] sm:$0xff]   ;;  %v405_v10 = vld [vmem:[#allocation7 + $0x20] sm:$0xff]   ;;  %v400_v11 = vld [vmem:[#allocation5 + $0x8] sm:$0xff]  }
  0x29   :  { %348 = vmatprep.subr.bf16.mxu0 %v501_v0  ;;  %368 = vmatprep.subr.bf16.mxu1 %v501_v0  ;;  %v406_v12 = vld [vmem:[#allocation7 + $0x18] sm:$0xff]   ;;  %v401_v13 = vld [vmem:[#allocation5] sm:$0xff]   ;;  %v407_v15 = vld [vmem:[#allocation7 + $0x10] sm:$0xff]  }
  0x2a   :  { %v61_v14 = vld [vmem:[#allocation2] sm:$0xff]  ;;  %v408_v17 = vld [vmem:[#allocation7 + $0x8] sm:$0xff]   ;;  %v409_v18 = vld [vmem:[#allocation7] sm:$0xff]  }
  0x2b   :  { %v62_v16 = vpack.c.bf16 %v61_v14, %v61_v14  ;;  %v310_v19 = vld [vmem:[%s554_s2] ss:$0 sm:$0xff]  ;;  %s300_s2 = sshll.u32 %s503_s11, 4  ;;  %s301_s2 = int_to_ptr.vmem [resolvable:$true] %s300_s2 }
  0x2c   :  { %349 = vmatpush3.bf16.msra.mxu0 %v395_v2  ;;  %369 = vmatpush3.bf16.msra.mxu1 %v403_v6  ;;  %v319_v28 = vld [vmem:[%s556_s4] ss:$0 sm:$0xff]  ;;  %s470_s12 = scalar_lea.vmem %s301_s2, 128  ;;  %p475_p2 = scmp.lt.s32.totalorder %s301_s2, %s301_s2 }
  0x2d   :  { %350 = vmatprep.subr.bf16.mxu0 %v501_v0  ;;  %370 = vmatprep.subr.bf16.mxu1 %v501_v0  ;;  %p471_p1 = scmp.ne.s32.totalorder %s301_s2, %s470_s12  ;;  %p476_p3 = scmp.lt.s32.totalorder %s470_s12, %s470_s12 }
  0x2f   :  { %p477_p4 = por %p476_p3, %p475_p2 }
  0x30   :  { %351 = vmatpush3.bf16.msra.mxu0 %v396_v3  ;;  %371 = vmatpush3.bf16.msra.mxu1 %v404_v8 }
  0x31   :  { %352 = vmatprep.subr.bf16.mxu0 %v501_v0  ;;  %372 = vmatprep.subr.bf16.mxu1 %v501_v0  ;;  %p478_p5 = pnand %p477_p4, %p471_p1 }
  0x34   :  { %353 = vmatpush3.bf16.msra.mxu0 %v397_v5  ;;  %373 = vmatpush3.bf16.msra.mxu1 %v405_v10 }
  0x35   :  { %354 = vmatprep.subr.bf16.mxu0 %v501_v0  ;;  %374 = vmatprep.subr.bf16.mxu1 %v501_v0 }
  0x38   :  { %355 = vmatpush3.bf16.msra.mxu0 %v398_v7  ;;  %375 = vmatpush3.bf16.msra.mxu1 %v406_v12 }
  0x39   :  { %356 = vmatprep.subr.bf16.mxu0 %v501_v0  ;;  %376 = vmatprep.subr.bf16.mxu1 %v501_v0 }
  0x3c   :  { %357 = vmatpush3.bf16.msra.mxu0 %v399_v9  ;;  %377 = vmatpush3.bf16.msra.mxu1 %v407_v15 }
  0x3d   :  { %358 = vmatprep.subr.bf16.mxu0 %v501_v0  ;;  %378 = vmatprep.subr.bf16.mxu1 %v501_v0 }
  0x40   :  { %359 = vmatpush3.bf16.msra.mxu0 %v400_v11  ;;  %379 = vmatpush3.bf16.msra.mxu1 %v408_v17 }
  0x41   :  { %360 = vmatprep.subr.bf16.mxu0 %v501_v0  ;;  %380 = vmatprep.subr.bf16.mxu1 %v501_v0 }
  0x44   :  { %361 = vmatpush3.bf16.msra.mxu0 %v401_v13  ;;  %381 = vmatpush3.bf16.msra.mxu1 %v409_v18 }
  0x47   :  { %363 = vmatmul.mubr.bf16.vlgmr.msra.gmra.mxu0 %v62_v16 }
 0x107   :  { %v168_v20 = vpop.f32.mrf.mxu0 }
 0x108   :  { %v169_v21 = vadd.f32 %v310_v19, %v168_v20 }
 0x109   :  { %v364_v22 = vpop.f32.mrf.mxu0 }
 0x10a   :  { %vm174_vm1 = vcmp.gt.f32.partialorder %v169_v21, 0.0  ;;  %v175_v23 = vmul.f32 0.01, %v169_v21 }
 0x10b   :  { %v171_v24 = vpop.f32.mrf.mxu0 }
 0x10c   :  { %v176_v25 = vsel %vm174_vm1, %v169_v21, %v175_v23 }
 0x10d   :  { %v365_v26 = vpop.f32.mrf.mxu0  ;;  %v177_v27 = vpack.c.bf16 %v176_v25, %v176_v25 }
 0x10f   :  { %383 = vmatmul.mubr.bf16.vlgmr.msra.gmra.mxu1 %v177_v27 }
 0x1cf   :  { %v283_v29 = vpop.f32.mrf.mxu1 }
 0x1d0   :  { %v284_v30 = vadd.f32 %v319_v28, %v283_v29 }
 0x1d1   :  { %v384_v31 = vpop.f32.mrf.mxu1 }
 0x1d2   :  { %v289_v32 = vadd.f32 %v284_v30, %v61_v14 }
 0x1d3   :  { %v286_v33 = vpop.f32.mrf.mxu1 }
 0x1d4   :  { %v291_v34 = vmul.f32 0.01, %v289_v32  ;;  %vm290_vm2 = vcmp.gt.f32.partialorder %v289_v32, 0.0 }
 0x1d5   :  { %v385_v35 = vpop.f32.mrf.mxu1 }
 0x1d6   :  { %v292_v36 = vsel %vm290_vm2, %v289_v32, %v291_v34 }
 0x1d7   :  { %293 = vst [vmem:[#allocation8] sm:$0xff] %v292_v36 }
 0x1d8   :  { %481 = shalt.err (!%p478_p5)
}
 0x1d9   :  { %303 = dma.vmem_to_hbm [thread:$0]  %s301_s2, 128, %s557_s5, [#allocation4]  }
 0x1da   :  { %494 = dma.done.wait [#allocation4], 128  }
 0x1db   :  { %495 = vsyncadd [#allocation4], 4294967168 }
 0x1dc   :  { %307 = vsyncpa [#allocation3], 1 }
 0x1dd   :  { %308 = vsyncpa [#allocation6], 1 }
 0x1de   :  { %309 = vsyncpa [#allocation4], 1 }

</bundles_post_ra>
